<compile_context>
chip_gen: v7x
topology: tpu7x:2x2x1
jax: 0.10.0
libtpu: 0.0.40
codegen_flags: <defaults>
</compile_context>

<pallas_src>
import jax
import jax.numpy as jnp
from jax.experimental import pallas as pl
from jax.experimental.pallas import tpu as pltpu

_EPS = 1e-5
_LANES = 128
_SUBLANES = 8
_VMEM_BUDGET = 8 * 1024 * 1024     # target bytes for double-buffered in + out blocks
_VMEM_LIMIT = 32 * 1024 * 1024     # scoped VMEM limit, safe on v5e / v6e / v7x


def _round_up(x, m):
    return ((x + m - 1) // m) * m


# ---------------------------------------------------------------------------
# Kernel A: channels-last LayerNorm.  Block = (tile_rows, C); per-row reduction
# over the lane axis.  Used for generic (..., C) inputs (WithBias_LayerNorm).
# ---------------------------------------------------------------------------
def _ln_rows_kernel(x_ref, w_ref, b_ref, o_ref):
    x = x_ref[...].astype(jnp.float32)                    # (T, C)
    mu = jnp.mean(x, axis=-1, keepdims=True)
    xc = x - mu
    var = jnp.mean(xc * xc, axis=-1, keepdims=True)       # unbiased=False
    y = xc * jax.lax.rsqrt(var + _EPS)
    o_ref[...] = (y * w_ref[...] + b_ref[...]).astype(o_ref.dtype)


def withbias_layernorm(x, weight, bias, *, vmem_budget_bytes=_VMEM_BUDGET):
    """WithBias_LayerNorm.forward: x (..., C); weight, bias: (C,)."""
    orig_shape = x.shape
    C = orig_shape[-1]
    x2 = x.reshape(-1, C)
    rows = x2.shape[0]

    w2 = weight.reshape(1, C).astype(jnp.float32)
    b2 = bias.reshape(1, C).astype(jnp.float32)

    itemsize = max(jnp.dtype(x.dtype).itemsize, 4)        # f32 compute worst case
    tile = max(1, vmem_budget_bytes // (4 * C * itemsize))
    tile = min(_round_up(tile, _SUBLANES), 4096)
    tile = max(_SUBLANES, min(tile, _round_up(rows, _SUBLANES)))
    grid = (pl.cdiv(rows, tile),)                         # ragged last block is masked

    out = pl.pallas_call(
        _ln_rows_kernel,
        out_shape=jax.ShapeDtypeStruct((rows, C), x.dtype),
        grid_spec=pltpu.PrefetchScalarGridSpec(
            num_scalar_prefetch=0,
            grid=grid,
            in_specs=[
                pl.BlockSpec((tile, C), lambda i: (i, 0)),
                pl.BlockSpec((1, C), lambda i: (0, 0)),
                pl.BlockSpec((1, C), lambda i: (0, 0)),
            ],
            out_specs=pl.BlockSpec((tile, C), lambda i: (i, 0)),
        ),
        compiler_params=pltpu.CompilerParams(
            dimension_semantics=("parallel",),
            vmem_limit_bytes=_VMEM_LIMIT,
        ),
    )(x2, w2, b2)
    return out.reshape(orig_shape)


# ---------------------------------------------------------------------------
# Kernel B: NCHW LayerNorm (the `LayerNorm` module = to_3d -> LN(C) -> to_4d).
# Operates in the native layout: channels on the sublane axis, flattened
# spatial (H*W) on the 128-lane axis, reduction over channels.  Lane-dense
# blocks even for small C, and no host-side transposes.
# ---------------------------------------------------------------------------
def _ln_chw_kernel(x_ref, w_ref, b_ref, o_ref):
    x = x_ref[0].astype(jnp.float32)                      # (C, T)
    mu = jnp.mean(x, axis=0, keepdims=True)               # (1, T)
    xc = x - mu
    var = jnp.mean(xc * xc, axis=0, keepdims=True)        # unbiased=False
    y = xc * jax.lax.rsqrt(var + _EPS)
    o_ref[0] = (y * w_ref[0] + b_ref[0]).astype(o_ref.dtype)


def layernorm_nchw(x, weight, bias, *, vmem_budget_bytes=_VMEM_BUDGET):
    """LayerNorm module forward: x (B, C, H, W), normalized over C per pixel."""
    B, C, H, W = x.shape
    HW = H * W
    x3 = x.reshape(B, C, HW)                              # contiguous -> free reshape
    w3 = weight.reshape(1, C, 1).astype(jnp.float32)
    b3 = bias.reshape(1, C, 1).astype(jnp.float32)

    itemsize = max(jnp.dtype(x.dtype).itemsize, 4)
    tile = max(1, vmem_budget_bytes // (4 * C * itemsize))
    if tile >= HW:
        tile = HW                                         # single spatial block
    else:
        tile = max((tile // _LANES) * _LANES, _LANES)     # lane-dense multiple of 128
    grid = (B, pl.cdiv(HW, tile))                         # ragged last block is masked

    out = pl.pallas_call(
        _ln_chw_kernel,
        out_shape=jax.ShapeDtypeStruct((B, C, HW), x.dtype),
        grid_spec=pltpu.PrefetchScalarGridSpec(
            num_scalar_prefetch=0,
            grid=grid,
            in_specs=[
                pl.BlockSpec((1, C, tile), lambda b, s: (b, 0, s)),
                pl.BlockSpec((1, C, 1), lambda b, s: (0, 0, 0)),
                pl.BlockSpec((1, C, 1), lambda b, s: (0, 0, 0)),
            ],
            out_specs=pl.BlockSpec((1, C, tile), lambda b, s: (b, 0, s)),
        ),
        compiler_params=pltpu.CompilerParams(
            dimension_semantics=("parallel", "parallel"),
            vmem_limit_bytes=_VMEM_LIMIT,
        ),
    )(x3, w3, b3)
    return out.reshape(B, C, H, W)


# ---------------------------------------------------------------------------
# Pure-JAX references
# ---------------------------------------------------------------------------
def _reference_lastdim(x, weight, bias):
    mu = jnp.mean(x, axis=-1, keepdims=True)
    var = jnp.var(x, axis=-1, keepdims=True)              # ddof=0 (unbiased=False)
    return (x - mu) / jnp.sqrt(var + _EPS) * weight + bias


def _reference_nchw(x, weight, bias):
    mu = jnp.mean(x, axis=1, keepdims=True)
    var = jnp.var(x, axis=1, keepdims=True)
    y = (x - mu) / jnp.sqrt(var + _EPS)
    return y * weight[None, :, None, None] + bias[None, :, None, None]


if __name__ == "__main__":
    key = jax.random.PRNGKey(0)
    k1, k2, k3, k4, k5 = jax.random.split(key, 5)

    # --- LayerNorm as used inside ILM: NCHW feature map, normalized over C.
    B, C, H, W = 2, 32, 16, 16
    x = jax.random.normal(k1, (B, C, H, W), dtype=jnp.float32)
    # Module __init__: weight=ones, bias=zeros; perturb so the affine path is exercised.
    weight = jnp.ones((C,), jnp.float32) + 0.1 * jax.random.normal(k2, (C,))
    bias = jnp.zeros((C,), jnp.float32) + 0.1 * jax.random.normal(k3, (C,))

    out = jax.block_until_ready(layernorm_nchw(x, weight, bias))
    ref = _reference_nchw(x, weight, bias)
    assert out.shape == x.shape
    assert jnp.allclose(out, ref, atol=1e-5, rtol=1e-5), "nchw mismatch vs reference"

    # --- Generic WithBias_LayerNorm on a (B, N, C) tensor with a ragged row
    #     count (21 rows) -> masked last block, no host-side padding/slice.
    xr = jax.random.normal(k4, (3, 7, C), dtype=jnp.float32)
    out_r = jax.block_until_ready(withbias_layernorm(xr, weight, bias))
    assert jnp.allclose(out_r, _reference_lastdim(xr, weight, bias),
                        atol=1e-5, rtol=1e-5), "ragged channels-last mismatch"

    # --- ILM's actual width in IdeNet (n_feat * 2 = 128 channels).
    C2 = 128
    x128 = jax.random.normal(k5, (2, C2, 8, 8), dtype=jnp.float32)
    w128 = jnp.ones((C2,), jnp.float32)
    b128 = jnp.zeros((C2,), jnp.float32)
    out128 = jax.block_until_ready(layernorm_nchw(x128, w128, b128))
    assert jnp.allclose(out128, _reference_nchw(x128, w128, b128),
                        atol=1e-5, rtol=1e-5), "c128 mismatch"

    print("KERNEL_OK")
</pallas_src>

<mosaic_0001>
module attributes {stable_mosaic.version = 11 : i64} {
  func.func @_ln_chw_kernel(%arg0: i32, %arg1: i32, %arg2: memref<1x32x256xf32, #tpu.memory_space<vmem>>, %arg3: memref<1x32x1xf32, #tpu.memory_space<vmem>>, %arg4: memref<1x32x1xf32, #tpu.memory_space<vmem>>, %arg5: memref<1x32x256xf32, #tpu.memory_space<vmem>>) attributes {dimension_semantics = [#tpu.dimension_semantics<parallel>, #tpu.dimension_semantics<parallel>], iteration_bounds = array<i64: 2, 1>, scalar_prefetch = 0 : i64, scratch_operands = 0 : i64, tpu.core_type = #tpu.core_type<tc>, window_params = [{transform_indices = @transform_0, window_bounds = array<i64: 1, 32, 256>}, {pipeline_mode = #tpu.pipeline_mode<synchronous>, transform_indices = @transform_1, window_bounds = array<i64: 1, 32, 1>}, {pipeline_mode = #tpu.pipeline_mode<synchronous>, transform_indices = @transform_2, window_bounds = array<i64: 1, 32, 1>}, {transform_indices = @transform_3, window_bounds = array<i64: 1, 32, 256>}]} {
    %c0 = arith.constant 0 : index
    %c0_0 = arith.constant 0 : index
    %c0_1 = arith.constant 0 : index
    %0 = vector.load %arg2[%c0, %c0_0, %c0_1] : memref<1x32x256xf32, #tpu.memory_space<vmem>>, vector<1x32x256xf32>
    %1 = vector.shape_cast %0 : vector<1x32x256xf32> to vector<32x256xf32>
    %cst = arith.constant dense<0.000000e+00> : vector<256xf32>
    %2 = vector.multi_reduction <add>, %1, %cst [0] : vector<32x256xf32> to vector<256xf32>
    %3 = vector.shape_cast %2 : vector<256xf32> to vector<1x256xf32>
    %cst_2 = arith.constant 3.200000e+01 : f32
    %4 = vector.broadcast %cst_2 : f32 to vector<1x256xf32>
    %5 = arith.divf %3, %4 : vector<1x256xf32>
    %6 = vector.broadcast %5 : vector<1x256xf32> to vector<32x256xf32>
    %7 = arith.subf %1, %6 : vector<32x256xf32>
    %8 = arith.mulf %7, %7 : vector<32x256xf32>
    %cst_3 = arith.constant dense<0.000000e+00> : vector<256xf32>
    %9 = vector.multi_reduction <add>, %8, %cst_3 [0] : vector<32x256xf32> to vector<256xf32>
    %10 = vector.shape_cast %9 : vector<256xf32> to vector<1x256xf32>
    %cst_4 = arith.constant 3.200000e+01 : f32
    %11 = vector.broadcast %cst_4 : f32 to vector<1x256xf32>
    %12 = arith.divf %10, %11 : vector<1x256xf32>
    %cst_5 = arith.constant 9.99999974E-6 : f32
    %13 = vector.broadcast %cst_5 : f32 to vector<1x256xf32>
    %14 = arith.addf %12, %13 : vector<1x256xf32>
    %15 = math.rsqrt %14 : vector<1x256xf32>
    %16 = vector.broadcast %15 : vector<1x256xf32> to vector<32x256xf32>
    %17 = arith.mulf %7, %16 : vector<32x256xf32>
    %c0_6 = arith.constant 0 : index
    %c0_7 = arith.constant 0 : index
    %c0_8 = arith.constant 0 : index
    %18 = vector.load %arg3[%c0_6, %c0_7, %c0_8] : memref<1x32x1xf32, #tpu.memory_space<vmem>>, vector<1x32x1xf32>
    %19 = vector.shape_cast %18 : vector<1x32x1xf32> to vector<32x1xf32>
    %20 = vector.broadcast %19 : vector<32x1xf32> to vector<32x256xf32>
    %21 = arith.mulf %17, %20 : vector<32x256xf32>
    %c0_9 = arith.constant 0 : index
    %c0_10 = arith.constant 0 : index
    %c0_11 = arith.constant 0 : index
    %22 = vector.load %arg4[%c0_9, %c0_10, %c0_11] : memref<1x32x1xf32, #tpu.memory_space<vmem>>, vector<1x32x1xf32>
    %23 = vector.shape_cast %22 : vector<1x32x1xf32> to vector<32x1xf32>
    %24 = vector.broadcast %23 : vector<32x1xf32> to vector<32x256xf32>
    %25 = arith.addf %21, %24 : vector<32x256xf32>
    %c0_12 = arith.constant 0 : index
    %c0_13 = arith.constant 0 : index
    %c0_14 = arith.constant 0 : index
    %26 = vector.load %arg5[%c0_12, %c0_13, %c0_14] : memref<1x32x256xf32, #tpu.memory_space<vmem>>, vector<1x32x256xf32>
    %27 = vector.shape_cast %26 : vector<1x32x256xf32> to vector<32x256xf32>
    %28 = vector.shape_cast %25 : vector<32x256xf32> to vector<1x32x256xf32>
    tpu.vector_store %arg5[%c0_12, %c0_13, %c0_14], %28 {strides = array<i32>} : memref<1x32x256xf32, #tpu.memory_space<vmem>>, vector<1x32x256xf32>,
    return
  }
  func.func @transform_0(%arg0: i32, %arg1: i32) -> (i32, i32, i32) {
    %c0_i32 = arith.constant 0 : i32
    %c0_i32_0 = arith.constant 0 : i32
    return %arg0, %c0_i32, %arg1 : i32, i32, i32
  }
  func.func @transform_1(%arg0: i32, %arg1: i32) -> (i32, i32, i32) {
    %c0_i32 = arith.constant 0 : i32
    %c0_i32_0 = arith.constant 0 : i32
    %c0_i32_1 = arith.constant 0 : i32
    %c0_i32_2 = arith.constant 0 : i32
    return %c0_i32, %c0_i32_0, %c0_i32_1 : i32, i32, i32
  }
  func.func @transform_2(%arg0: i32, %arg1: i32) -> (i32, i32, i32) {
    %c0_i32 = arith.constant 0 : i32
    %c0_i32_0 = arith.constant 0 : i32
    %c0_i32_1 = arith.constant 0 : i32
    %c0_i32_2 = arith.constant 0 : i32
    return %c0_i32, %c0_i32_0, %c0_i32_1 : i32, i32, i32
  }
  func.func @transform_3(%arg0: i32, %arg1: i32) -> (i32, i32, i32) {
    %c0_i32 = arith.constant 0 : i32
    %c0_i32_0 = arith.constant 0 : i32
    return %arg0, %c0_i32, %arg1 : i32, i32, i32
  }
}

</mosaic_0001>

<bundles_post_ra>
// kernel: tpu_custom_call.1
= control target key start
LH: loop header
LB: loop body
LE: loop exit
PB: predicated region body
PF: predicated region fallthrough
CT: control target
= control target key end

     0   :  { %8 = vsyncpa [#allocation3], 0  ;;  %s905_s0 = inlined_call_operand.hbm [shape: f32[2,32,256], index: 0, kind: input, shape index: {}]   ;;  %s906_s1 = inlined_call_operand.vmem [shape: f32[1,32,1], index: 1, kind: input, shape index: {}]   ;;  %s907_s2 = inlined_call_operand.vmem [shape: f32[1,32,1], index: 2, kind: input, shape index: {}]   ;;  %s908_s3 = inlined_call_operand.hbm [shape: f32[2,32,256], index: 3, kind: output, shape index: {}]  }
   0x1   :  { %10 = vsyncpa [#allocation3 + $0x1], 0 }
   0x2   :  { %11 = vsyncpa [#allocation4], 0 }
   0x3   :  { %13 = vsyncpa [#allocation4 + $0x1], 0  ;;  %s692_s12 = smov 0   ;;  %s694_s13 = smov 0  }
   0x4   :  { %s696_s14 = smov 0   ;;  %s698_s15 = smov 0  }
   0x5   :  { %s700_s16 = smov 0   ;;  %s702_s17 = smov 0  }
   0x6 LB: > { %s461_s18 = sadd.s32 4294967295, %s663_s17   ;;  %s462_s19 = sadd.s32 4294967294, %s663_s17   ;;  %s663_s17 = sphi %s702_s17, %s19_s17   ;;  %s659_s16 = sphi %s700_s16, %s923_s16   ;;  %s655_s15 = sphi %s698_s15, %s922_s15   ;;  %s651_s14 = sphi %s696_s14, %s921_s14   ;;  %s647_s13 = sphi %s694_s13, %s920_s13   ;;  %s643_s12 = sphi %s692_s12, %s919_s12  }
   0x7   : > { %s31_s20 = sadd.s32 1, %s659_s16  ;;  %s40_s21 = sadd.s32 1, %s651_s14 }
   0x8   : > { %p33_p0 = scmp.ge.s32.totalorder %s31_s20, 2  ;;  %p47_p1 = scmp.ne.s32.totalorder %s651_s14, %s647_s13 }
   0x9   : > { %p48_p2 = scmp.eq.s32.totalorder %s663_s17, 0  ;;  %p53_p3 = scmp.ne.s32.totalorder %s647_s13, %s643_s12 }
   0xa   : > { %s925_s20 = smov (%p33_p0, %s31_s20), 0  ;;  %p54_p5 = scmp.eq.s32.totalorder %s461_s18, 0 }
   0xb   : > { %p733_p4 = por %p48_p2, %p47_p1  ;;  %s35_s23 = ssub.s32 %s659_s16, %s925_s20 }
   0xc   : > { %p121_p6 = scmp.eq.s32.totalorder %s461_s18, 1  ;;  %p38_p7 = scmp.eq.s32.totalorder %s35_s23, 0 }
   0xd   : > { %p739_p8 = por %p54_p5, %p53_p3  ;;  %p127_p10 = scmp.eq.s32.totalorder %s462_s19, 1 }
   0xe   : > { %p743_p9 = por %p121_p6, %p47_p1  ;;  %p490_p13 = scmp.lt.s32.totalorder %s663_s17, 2 }
   0xf   : > { %s748_s26 = scalar_select %p38_p7, %s651_s14, %s40_s21  }
  0x10   : > { %s912_s25 = scalar_select %p743_p9, 1, 0 }
  0x11   : > { %p750_p11 = por %p127_p10, %p53_p3  ;;  %s153_s28 = sand.u32 1, %s651_s14  }
  0x12   : > { %s465_s29 = sshll.u32 %s153_s28, 6  ;;  %s476_s30 = sshll.u32 %s659_s16, 10 }
  0x13   : > { %s913_s27 = scalar_select %p750_p11, 1, 0 }
  0x14   : > { %s761_s6 = scalar_lea.hbm %s905_s0, %s476_s30  ;;  %s157_s7 = scalar_lea.vmem [#allocation2], %s465_s29 }
  0x15   : > { %s166_s8 = sshll.u32 %s157_s7, 4  ;;  %p767_p0 = pnand %p490_p13, %p733_p4  ;;  %s763_s8 = int_to_ptr.vmem [resolvable:$true] %s166_s8 }
  0x16   : > { %s772_s10 = scalar_lea.sflag [#allocation3], %s153_s28  ;;  %s551_s11 = scalar_lea.hbm %s761_s6, 1024 }
  0x17   : > { %p552_p2 = scmp.ne.s32.totalorder %s761_s6, %s551_s11  ;;  %p553_p3 = pneg %p767_p0 }
  0x18   : > { %s556_s21 = scalar_lea.hbm %s905_s0, 2048  ;;  %p557_p4 = scmp.lt.u32.totalorder %s761_s6, %s905_s0 }
  0x19   : > { %p554_p5 = pnand %p553_p3, %p552_p2  ;;  %p558_p7 = scmp.lt.u32.totalorder %s556_s21, %s551_s11 }
  0x1a   : > { %p560_p13 = scmp.lt.u32.totalorder %s551_s11, %s761_s6 }
  0x1b   : > { %p555_p6 = pneg %p554_p5  ;;  %p559_p10 = por %p558_p7, %p557_p4 }
  0x1d   : > { %p561_p12 = por %p560_p13, %p559_p10 }
  0x1f   : > { %p562_p1 = pnand %p561_p12, %p555_p6 }
  0x21   : > { %565 = shalt.err (!%p562_p1)
}
  0x22   : > { %s566_s28 = scalar_lea.vmem %s763_s8, 1024  ;;  %s665_s29 = smov [#allocation2]  }
  0x23   : > { %p567_p2 = scmp.ne.s32.totalorder %s763_s8, %s566_s28  ;;  %s571_s30 = sshll.u32 %s665_s29, 4  ;;  %s572_s30 = int_to_ptr.vmem [resolvable:$false] %s571_s30 }
  0x24   : > { %s573_s4 = scalar_lea.vmem %s572_s30, 2048  ;;  %p574_p9 = scmp.lt.s32.totalorder %s763_s8, %s572_s30 }
  0x25   : > { %p569_p5 = pnand %p567_p2, %p553_p3  ;;  %p575_p4 = scmp.lt.s32.totalorder %s573_s4, %s566_s28 }
  0x27   : > { %p570_p11 = pneg %p569_p5  ;;  %p576_p7 = por %p575_p4, %p574_p9 }
  0x29   : > { %p577_p10 = pnand %p576_p7, %p570_p11 }
  0x2b   : > { %580 = shalt.err (!%p577_p10)
}
  0x2c   : > { %s666_s5 = smov 256   ;;  %s667_s7 = smov 16  }
  0x2d   : > { %485 = dma.hbm_to_vmem [thread:$0]  (!%p767_p0), %s761_s6, 1024, %s763_s8, %s772_s10, %s666_s5, %s666_s5, %s667_s7  }
  0x2e   : > { %p174_p12 = scmp.lt.s32.totalorder %s663_s17, 3  ;;  %p915_p1 = scmp.ge.s32.totalorder %s663_s17, 1 }
  0x30   : > { %p175_p3 = pnand %p915_p1, %p174_p12 }
  0x31   : > { %s804_s11 = sand.u32 (!%p175_p3), 1, %s647_s13  }
  0x32   : > { %178 = sbr.rel (%p175_p3) target bundleno = 218 (0xda), region = 32  ;;  %s469_s18 = sshll.u32 (!%p175_p3), %s804_s11, 6 }
  0x33   : > { %s181_s19 = scalar_lea.sflag (!%p175_p3), [#allocation3], %s804_s11  ;;  %s810_s21 = scalar_lea.vmem (!%p175_p3), [#allocation2], %s469_s18 }
  0x39   : > { %634 = dma.done.wait (%p739_p8), %s181_s19, 1024  }
  0x3a   : > { %636 = vsyncadd (%p739_p8), %s181_s19, 4294966272  ;;  %v668_v0 = vmov 0   ;;  %v288_v1 = vld [vmem:[%s906_s1 + $0x10] sm:$0xff]  ;;  %v286_v2 = vld [vmem:[%s906_s1] sm:$0xff]  ;;  %s477_s10 = sshll.u32 %s655_s15, 10  ;;  %s359_s23 = scalar_lea.sflag [#allocation4], %s804_s11 }
  0x3b   : > { %546 = vset.pattern.permute.xlu1 %v668_v0  ;;  %545 = vset.pattern.permute.xlu0 %v668_v0  ;;  %v289_v3 = vld [vmem:[%s906_s1 + $0x18] sm:$0xff]  ;;  %v287_v4 = vld [vmem:[%s906_s1 + $0x8] sm:$0xff]  ;;  %v318_v6 = vld [vmem:[%s907_s2] sm:$0xff]  ;;  %s856_s15 = scalar_lea.hbm %s908_s3, %s477_s10  ;;  %p916_p9 = scmp.ne.s32.totalorder %s912_s25, 0 }
  0x3c   : > { %302 = vperm.xlu1 %546, %v288_v1   ;;  %292 = vperm.xlu0 %545, %v286_v2   ;;  %v319_v5 = vld [vmem:[%s907_s2 + $0x8] sm:$0xff]  ;;  %v321_v7 = vld [vmem:[%s907_s2 + $0x18] sm:$0xff]  ;;  %v320_v8 = vld [vmem:[%s907_s2 + $0x10] sm:$0xff]  ;;  %s669_s28 = smov [#allocation5]  }
  0x3d   : > { %v209_v9 = vld [vmem:[%s810_s21] sm:$0xff]  ;;  %v211_v10 = vld [vmem:[%s810_s21 + $0x10] sm:$0xff]  ;;  %v210_v11 = vld [vmem:[%s810_s21 + $0x8] sm:$0xff]  ;;  %s585_s29 = sshll.u32 %s669_s28, 4  ;;  %s586_s29 = int_to_ptr.vmem [resolvable:$false] %s585_s29 }
  0x3e   : > { %v212_v12 = vld [vmem:[%s810_s21 + $0x18] sm:$0xff]  ;;  %v217_v13 = vadd.f32 %v211_v10, %v209_v9  ;;  %v213_v14 = vld [vmem:[%s810_s21 + $0x20] sm:$0xff]  ;;  %v214_v16 = vld [vmem:[%s810_s21 + $0x28] sm:$0xff]  ;;  %s587_s30 = scalar_lea.vmem %s586_s29, 2048 }
  0x3f   : > { %v226_v15 = vadd.f32 %v212_v12, %v210_v11  ;;  %v215_v18 = vld [vmem:[%s810_s21 + $0x30] sm:$0xff]  ;;  %v216_v20 = vld [vmem:[%s810_s21 + $0x38] sm:$0xff]  ;;  %s206_s21 = scalar_lea.vmem [#allocation5], %s469_s18 }
  0x40   : > { %307 = vperm.xlu1 %546, %v289_v3   ;;  %297 = vperm.xlu0 %545, %v287_v4   ;;  %v218_v17 = vadd.f32 %v217_v13, %v213_v14  ;;  %s374_s9 = sshll.u32 %s206_s21, 4  ;;  %s851_s9 = int_to_ptr.vmem [resolvable:$true] %s374_s9 }
  0x41   : > { %v227_v19 = vadd.f32 %v226_v15, %v214_v16  ;;  %s581_s24 = scalar_lea.vmem %s851_s9, 1024  ;;  %p588_p6 = scmp.lt.s32.totalorder %s851_s9, %s586_s29 }
  0x42   : > { %v219_v21 = vadd.f32 %v218_v17, %v215_v18  ;;  %p582_p8 = scmp.ne.s32.totalorder %s851_s9, %s581_s24  ;;  %p589_p13 = scmp.lt.s32.totalorder %s587_s30, %s581_s24 }
  0x43   : > { %v228_v22 = vadd.f32 %v227_v19, %v216_v20 }
  0x44   : > { %329 = vperm.xlu1 %546, %v319_v5   ;;  %324 = vperm.xlu0 %545, %v318_v6   ;;  %v220_v23 = vrot.slane %v219_v21, 4  ;;  %p583_p11 = pnand %p582_p8, %p916_p9  ;;  %p590_p2 = por %p589_p13, %p588_p6 }
  0x45   : > { %v229_v24 = vrot.slane %v228_v22, 4 }
  0x46   : > { %v221_v25 = vadd.f32 %v220_v23, %v219_v21  ;;  %p584_p0 = pneg %p583_p11 }
  0x47   : > { %v230_v26 = vadd.f32 %v229_v24, %v228_v22 }
  0x48   : > { %339 = vperm.xlu1 %546, %v321_v7   ;;  %334 = vperm.xlu0 %545, %v320_v8   ;;  %v222_v27 = vrot.slane %v221_v25, 2  ;;  %p591_p5 = pnand %p590_p2, %p584_p0 }
  0x49   : > { %v231_v28 = vrot.slane %v230_v26, 2 }
  0x4a   : > { %v223_v29 = vadd.f32 %v222_v27, %v221_v25 }
  0x4b   : > { %v232_v30 = vadd.f32 %v231_v28, %v230_v26 }
  0x4c   : > { %v224_v31 = vrot.slane %v223_v29, 1 }
  0x4d   : > { %v233_v32 = vrot.slane %v232_v30, 1 }
  0x4e   : > { %v225_v33 = vadd.f32 %v224_v31, %v223_v29 }
  0x4f   : > { %v234_v34 = vadd.f32 %v233_v32, %v232_v30 }
  0x50   : > { %v236_v35 = vmul.f32 0.03125, %v225_v33 }
  0x51   : > { %v237_v36 = vmul.f32 0.03125, %v234_v34 }
  0x52   : > { %v238_v37 = vsub.f32 %v209_v9, %v236_v35  ;;  %v240_v38 = vsub.f32 %v211_v10, %v236_v35  ;;  %v242_v41 = vsub.f32 %v213_v14, %v236_v35  ;;  %v244_v47 = vsub.f32 %v215_v18, %v236_v35 }
  0x53   : > { %v239_v39 = vsub.f32 %v210_v11, %v237_v36  ;;  %v241_v40 = vsub.f32 %v212_v12, %v237_v36  ;;  %v243_v44 = vsub.f32 %v214_v16, %v237_v36  ;;  %v245_v50 = vsub.f32 %v216_v20, %v237_v36 }
  0x54   : > { %v246_v42 = vmul.f32 %v238_v37, %v238_v37  ;;  %v248_v43 = vmul.f32 %v240_v38, %v240_v38  ;;  %v250_v48 = vmul.f32 %v242_v41, %v242_v41  ;;  %v252_v53 = vmul.f32 %v244_v47, %v244_v47 }
  0x55   : > { %v247_v45 = vmul.f32 %v239_v39, %v239_v39  ;;  %v249_v46 = vmul.f32 %v241_v40, %v241_v40  ;;  %v251_v51 = vmul.f32 %v243_v44, %v243_v44  ;;  %v253_v55 = vmul.f32 %v245_v50, %v245_v50 }
  0x56   : > { %v254_v49 = vadd.f32 %v248_v43, %v246_v42 }
  0x57   : > { %v263_v52 = vadd.f32 %v249_v46, %v247_v45 }
  0x58   : > { %v255_v54 = vadd.f32 %v254_v49, %v250_v48 }
  0x59   : > { %v264_v56 = vadd.f32 %v263_v52, %v251_v51 }
  0x5a   : > { %v256_v57 = vadd.f32 %v255_v54, %v252_v53 }
  0x5b   : > { %v265_v58 = vadd.f32 %v264_v56, %v253_v55 }
  0x5c   : > { %v257_v59 = vrot.slane %v256_v57, 4 }
  0x5d   : > { %v266_v60 = vrot.slane %v265_v58, 4 }
  0x5e   : > { %v258_v61 = vadd.f32 %v257_v59, %v256_v57 }
  0x5f   : > { %v267_v62 = vadd.f32 %v266_v60, %v265_v58 }
  0x60   : > { %v259_v63 = vrot.slane %v258_v61, 2 }
  0x61   : > { %v268_v0 = vrot.slane %v267_v62, 2 }
  0x62   : > { %v260_v1 = vadd.f32 %v259_v63, %v258_v61 }
  0x63   : > { %v269_v2 = vadd.f32 %v268_v0, %v267_v62 }
  0x64   : > { %v261_v3 = vrot.slane %v260_v1, 1 }
  0x65   : > { %v270_v4 = vrot.slane %v269_v2, 1 }
  0x66   : > { %v262_v5 = vadd.f32 %v261_v3, %v260_v1 }
  0x67   : > { %v271_v6 = vadd.f32 %v270_v4, %v269_v2 }
  0x68   : > { %v272_v7 = vmul.f32 0.03125, %v262_v5 }
  0x69   : > { %v273_v8 = vmul.f32 0.03125, %v271_v6 }
  0x6a   : > { %v274_v9 = vadd.f32 1e-05, %v272_v7 }
  0x6b   : > { %v275_v10 = vadd.f32 1e-05, %v273_v8 }
  0x6c   : > { %547 = vrsqrt.f32 %v274_v9 }
  0x6d   : > { %549 = vrsqrt.f32 %v275_v10 }
  0x76   : > { %v548_v11 = vpop.eup %547 }
  0x77   : > { %v550_v12 = vpop.eup %549  ;;  %v278_v15 = vmul.f32 %v548_v11, %v238_v37  ;;  %v280_v17 = vmul.f32 %v548_v11, %v240_v38  ;;  %v282_v21 = vmul.f32 %v548_v11, %v242_v41  ;;  %v284_v23 = vmul.f32 %v548_v11, %v244_v47 }
  0x78   : > { %v279_v16 = vmul.f32 %v550_v12, %v239_v39  ;;  %v281_v18 = vmul.f32 %v550_v12, %v241_v40  ;;  %v283_v22 = vmul.f32 %v550_v12, %v243_v44  ;;  %v285_v24 = vmul.f32 %v550_v12, %v245_v50 }
  0xbb   : > { %v303_v13 = vpop.permute.xlu1 %302  ;;  %v293_v14 = vpop.permute.xlu0 %292 }
  0xbc   : > { %v310_v25 = vmul.f32 %v293_v14, %v278_v15  ;;  %v311_v26 = vmul.f32 %v293_v14, %v279_v16  ;;  %v314_v35 = vmul.f32 %v303_v13, %v282_v21  ;;  %v315_v36 = vmul.f32 %v303_v13, %v283_v22 }
  0xbf   : > { %v308_v19 = vpop.permute.xlu1 %307  ;;  %v298_v20 = vpop.permute.xlu0 %297 }
  0xc0   : > { %v312_v27 = vmul.f32 %v298_v20, %v280_v17  ;;  %v313_v28 = vmul.f32 %v298_v20, %v281_v18  ;;  %v316_v37 = vmul.f32 %v308_v19, %v284_v23  ;;  %v317_v38 = vmul.f32 %v308_v19, %v285_v24 }
  0xc3   : > { %v330_v29 = vpop.permute.xlu1 %329  ;;  %v325_v30 = vpop.permute.xlu0 %324 }
  0xc4   : > { %v344_v31 = vadd.f32 %v330_v29, %v312_v27  ;;  %v345_v32 = vadd.f32 %v330_v29, %v313_v28  ;;  %v342_v33 = vadd.f32 %v325_v30, %v310_v25  ;;  %v343_v34 = vadd.f32 %v325_v30, %v311_v26 }
  0xc6   : > { %352 = vst [vmem:[%s206_s21 + $0x10] sm:$0xff] %v344_v31  ;;  %353 = vst [vmem:[%s206_s21 + $0x18] sm:$0xff] %v345_v32 }
  0xc7   : > { %350 = vst [vmem:[%s206_s21] sm:$0xff] %v342_v33  ;;  %351 = vst [vmem:[%s206_s21 + $0x8] sm:$0xff] %v343_v34  ;;  %v340_v39 = vpop.permute.xlu1 %339  ;;  %v335_v40 = vpop.permute.xlu0 %334 }
  0xc8   : > { %v348_v41 = vadd.f32 %v340_v39, %v316_v37  ;;  %v349_v42 = vadd.f32 %v340_v39, %v317_v38  ;;  %v346_v43 = vadd.f32 %v335_v40, %v314_v35  ;;  %v347_v44 = vadd.f32 %v335_v40, %v315_v36 }
  0xca   : > { %356 = vst [vmem:[%s206_s21 + $0x30] sm:$0xff] %v348_v41  ;;  %357 = vst [vmem:[%s206_s21 + $0x38] sm:$0xff] %v349_v42 }
  0xcb   : > { %354 = vst [vmem:[%s206_s21 + $0x20] sm:$0xff] %v346_v43  ;;  %355 = vst [vmem:[%s206_s21 + $0x28] sm:$0xff] %v347_v44 }
  0xcc   : > { %594 = shalt.err (!%p591_p5)
}
  0xcd   : > { %s595_s4 = scalar_lea.hbm %s856_s15, 1024  ;;  %s599_s19 = scalar_lea.hbm %s908_s3, 2048 }
  0xce   : > { %p596_p4 = scmp.ne.s32.totalorder %s856_s15, %s595_s4  ;;  %p600_p12 = scmp.lt.u32.totalorder %s856_s15, %s908_s3 }
  0xcf   : > { %p601_p1 = scmp.lt.u32.totalorder %s599_s19, %s595_s4  ;;  %p603_p8 = scmp.lt.u32.totalorder %s595_s4, %s856_s15 }
  0xd0   : > { %p597_p7 = pnand %p596_p4, %p916_p9 }
  0xd1   : > { %p602_p3 = por %p601_p1, %p600_p12 }
  0xd2   : > { %p598_p10 = pneg %p597_p7 }
  0xd3   : > { %p604_p11 = por %p603_p8, %p602_p3 }
  0xd5   : > { %p605_p0 = pnand %p604_p11, %p598_p10 }
  0xd7   : > { %608 = shalt.err (!%p605_p0)
}
  0xd8   : > { %s670_s21 = smov 256   ;;  %s671_s10 = smov 16  }
  0xd9   : > { %480 = dma.vmem_to_hbm [thread:$0]  (%p916_p9), %s851_s9, 1024, %s856_s15, %s359_s23, %s670_s21, %s670_s21, %s671_s10  }
  0xda PF: > { %s389_s18 = sand.u32 1, %s643_s12   ;;  %p917_p6 = scmp.ne.s32.totalorder %s913_s27, 0 }
  0xdb   : > { %p918_p13 = scmp.ge.s32.totalorder %s663_s17, 2  ;;  %s390_s22 = scalar_lea.sflag [#allocation4], %s389_s18 }
  0xdd   : > { %p487_p2 = pnand %p918_p13, %p917_p6 }
  0xdf   : > { %638 = dma.done.wait (!%p487_p2), %s390_s22, 1024  }
  0xe0   : > { %640 = vsyncadd (!%p487_p2), %s390_s22, 4294966272  ;;  %s19_s17 = sadd.s32 1, %s663_s17   ;;  %s919_s12 = smov %s647_s13 }
  0xe1   : > { %p16_p5 = scmp.ge.s32.totalorder %s19_s17, 4   ;;  %s920_s13 = smov %s651_s14 }
  0xe2   : > { %s921_s14 = smov %s748_s26  ;;  %s922_s15 = smov %s659_s16 }
  0xe3   : > { %s923_s16 = smov %s925_s20  ;;  %18 = sbr.rel (!%p16_p5) target bundleno = 6 (0x6), region = 77 }
  0xea   :  { %395 = vsyncpa [#allocation3], 1 }
  0xeb   :  { %397 = vsyncpa [#allocation3 + $0x1], 1 }
  0xec   :  { %398 = vsyncpa [#allocation4], 1 }
  0xed   :  { %400 = vsyncpa [#allocation4 + $0x1], 1 }

</bundles_post_ra>
